<compile_context>
chip_gen: v6e
topology: v6e:2x2x1
jax: 0.10.0
libtpu: 0.0.40
codegen_flags: <defaults>
</compile_context>

<pallas_src>
import jax
import jax.numpy as jnp
from jax.experimental import pallas as pl
from jax.experimental.pallas import tpu as pltpu

_LANE = 128
_SUBLANE = 8
# Per-buffer tile budget (bytes). Double-buffered input + output blocks plus
# the resident embedding row stay well under every chip's VMEM.
_MAX_TILE_BYTES = 4 * 1024 * 1024
_MAX_COL_TILE = 8192


def _pos_emb_kernel(x_ref, emb_ref, o_ref):
    # x_ref / o_ref: (TB, TN); emb_ref: (1, TN) broadcast over the row axis.
    # Keep it a single add — any extra per-element work lengthens the
    # store-slot-limited inner loop (esp. v5e with 1 vst slot).
    o_ref[...] = x_ref[...] + emb_ref[...]


def _round_down(n, align):
    return (n // align) * align


def _choose_tiles(B, N, itemsize):
    """Pick (tb, tn): lane-dense column tile, row tile within the byte budget."""
    # Column tile: multiple of 128 (unmasked stores on full blocks). Full
    # extent if N itself is smaller than one lane group (always legal).
    if N <= _LANE:
        tn = N
    else:
        tn = _round_down(min(_MAX_COL_TILE, N), _LANE)

    # Row tile: as many rows as fit the per-buffer budget; either the full
    # batch (always legal) or a multiple of 8 (sublane-aligned).
    budget_rows = max(1, _MAX_TILE_BYTES // (tn * itemsize))
    if B <= budget_rows:
        tb = B
    else:
        tb = max(_SUBLANE, _round_down(budget_rows, _SUBLANE))
    return tb, tn


def positional_embedding_forward(x, embedding):
    """x: (B, C, H, W); embedding: (C, max_size, max_size).

    Returns x + embedding[:, :H, :W] broadcast over the batch (PyTorch forward).
    """
    B, C, H, W = x.shape
    N = C * H * W
    itemsize = jnp.dtype(x.dtype).itemsize

    # Glue: slice the learned embedding to the input spatial extent, then
    # flatten everything to a lane-dense 2D layout (last axis = C*H*W). The
    # slice+reshape copies only C*H*W elements (parameter-sized, negligible
    # next to the B*C*H*W activation traffic).
    # TODO(synk): if the embedding ever dwarfs the activation, read the
    # (:, :H, :W) window directly from HBM inside the kernel instead of this
    # XLA slice copy.
    emb = embedding[:, :H, :W].astype(x.dtype).reshape(1, N)
    x2 = x.reshape(B, N)  # contiguous reshape: free (bitcast-level)

    tb, tn = _choose_tiles(B, N, itemsize)

    # Columns outer (slow), rows inner (fast): emb's block index only changes
    # with the outer axis, so its VMEM tile is reused across the row sweep.
    grid = (pl.cdiv(N, tn), pl.cdiv(B, tb))

    out = pl.pallas_call(
        _pos_emb_kernel,
        out_shape=jax.ShapeDtypeStruct((B, N), x.dtype),
        grid_spec=pltpu.PrefetchScalarGridSpec(
            num_scalar_prefetch=0,
            grid=grid,
            in_specs=[
                pl.BlockSpec((tb, tn), lambda c, r: (r, c)),
                pl.BlockSpec((1, tn), lambda c, r: (0, c)),
            ],
            out_specs=pl.BlockSpec((tb, tn), lambda c, r: (r, c)),
        ),
        compiler_params=pltpu.CompilerParams(
            dimension_semantics=("parallel", "parallel"),
            vmem_limit_bytes=48 * 1024 * 1024,
        ),
    )(x2, emb)

    return out.reshape(B, C, H, W)


if __name__ == "__main__":
    # Small shapes consistent with the module: dim=4 channels, max_size=24,
    # input spatial 16x16, batch 2.
    B, C, H, W = 2, 4, 16, 16
    max_size = 24

    key = jax.random.PRNGKey(0)
    k_x, k_e = jax.random.split(key)

    x = jax.random.normal(k_x, (B, C, H, W), dtype=jnp.float32)
    # Deterministic "torch.randn"-style parameter init.
    embedding = jax.random.normal(k_e, (C, max_size, max_size), dtype=jnp.float32)

    fwd = jax.jit(positional_embedding_forward)
    out = jax.block_until_ready(fwd(x, embedding))

    # Reference check against plain-JAX semantics of the PyTorch forward.
    ref = x + embedding[:, :H, :W][None, ...]
    assert out.shape == x.shape
    assert jnp.allclose(out, ref, atol=1e-6), "mismatch vs reference"

    print("KERNEL_OK")
</pallas_src>

<mosaic_0001>
module attributes {stable_mosaic.version = 11 : i64} {
  func.func @_pos_emb_kernel(%arg0: i32, %arg1: i32, %arg2: memref<2x1024xf32, #tpu.memory_space<vmem>>, %arg3: memref<1x1024xf32, #tpu.memory_space<vmem>>, %arg4: memref<2x1024xf32, #tpu.memory_space<vmem>>) attributes {dimension_semantics = [#tpu.dimension_semantics<parallel>, #tpu.dimension_semantics<parallel>], iteration_bounds = array<i64: 1, 1>, scalar_prefetch = 0 : i64, scratch_operands = 0 : i64, tpu.core_type = #tpu.core_type<tc>, window_params = [{transform_indices = @transform_0, window_bounds = array<i64: 2, 1024>}, {transform_indices = @transform_1, window_bounds = array<i64: 1, 1024>}, {transform_indices = @transform_2, window_bounds = array<i64: 2, 1024>}]} {
    %c0 = arith.constant 0 : index
    %c0_0 = arith.constant 0 : index
    %0 = vector.load %arg2[%c0, %c0_0] : memref<2x1024xf32, #tpu.memory_space<vmem>>, vector<2x1024xf32>
    %c0_1 = arith.constant 0 : index
    %c0_2 = arith.constant 0 : index
    %1 = vector.load %arg3[%c0_1, %c0_2] : memref<1x1024xf32, #tpu.memory_space<vmem>>, vector<1x1024xf32>
    %2 = vector.broadcast %1 : vector<1x1024xf32> to vector<2x1024xf32>
    %3 = arith.addf %0, %2 : vector<2x1024xf32>
    %c0_3 = arith.constant 0 : index
    %c0_4 = arith.constant 0 : index
    %4 = vector.load %arg4[%c0_3, %c0_4] : memref<2x1024xf32, #tpu.memory_space<vmem>>, vector<2x1024xf32>
    tpu.vector_store %arg4[%c0_3, %c0_4], %3 {strides = array<i32>} : memref<2x1024xf32, #tpu.memory_space<vmem>>, vector<2x1024xf32>,
    return
  }
  func.func @transform_0(%arg0: i32, %arg1: i32) -> (i32, i32) {
    %c0_i32 = arith.constant 0 : i32
    return %arg1, %arg0 : i32, i32
  }
  func.func @transform_1(%arg0: i32, %arg1: i32) -> (i32, i32) {
    %c0_i32 = arith.constant 0 : i32
    %c0_i32_0 = arith.constant 0 : i32
    return %c0_i32, %arg0 : i32, i32
  }
  func.func @transform_2(%arg0: i32, %arg1: i32) -> (i32, i32) {
    %c0_i32 = arith.constant 0 : i32
    return %arg1, %arg0 : i32, i32
  }
}

</mosaic_0001>

<bundles_post_ra>
// kernel: positional_embedding_forward.1
= control target key start
LH: loop header
LB: loop body
LE: loop exit
PB: predicated region body
PF: predicated region fallthrough
CT: control target
= control target key end

     0   :  { %v15_v0 = vlaneseq  ;;  %v92_v1 = vmov 1983009808   ;;  %s123_s1 = inlined_call_operand.vmem [shape: f32[1,1024], index: 1, kind: input, shape index: {}]   ;;  %s124_s0 = inlined_call_operand.vmem [shape: f32[2,1024], index: 0, kind: input, shape index: {}]   ;;  %s125_s2 = inlined_call_operand.vmem [shape: f32[2,1024], index: 2, kind: output, shape index: {}]  }
   0x1   :  { %v50_v2 = vunpack.c.l.s4 %v92_v1  ;;  %v13_v4 = vld [vmem:[%s123_s1] sm:$0xff]  ;;  %v12_v34 = vld [vmem:[%s124_s0 + $0x8] sm:$0xff] }
   0x2   :  { %v16_v3 = vshrl.u32 %v15_v0, 7  ;;  %v11_v28 = vld [vmem:[%s124_s0] sm:$0xff] }
   0x3   :  { %v51_v5 = vunpack.c.0.s8 %v50_v2 }
   0x4   :  { %v17_v6 = vsub.s32 0, %v16_v3  ;;  %v21_v7 = vsub.s32 1, %v16_v3  ;;  %v25_v8 = vsub.s32 2, %v16_v3  ;;  %v29_v9 = vsub.s32 3, %v16_v3 }
   0x5   :  { %v54_v10 = vsub.s32 %v51_v5, %v16_v3  ;;  %v33_v11 = vsub.s32 4, %v16_v3  ;;  %v37_v12 = vsub.s32 5, %v16_v3  ;;  %v41_v13 = vsub.s32 6, %v16_v3 }
   0x6   :  { %v18_v14 = vrot.slane %v13_v4, %v17_v6  ;;  %v22_v15 = vrot.slane %v13_v4, %v21_v7  ;;  %v26_v16 = vrot.slane %v13_v4, %v25_v8  ;;  %v30_v17 = vrot.slane %v13_v4, %v29_v9 }
   0x7   :  { %v34_v18 = vrot.slane %v13_v4, %v33_v11  ;;  %v38_v19 = vrot.slane %v13_v4, %v37_v12  ;;  %v42_v20 = vrot.slane %v13_v4, %v41_v13  ;;  %v45_v21 = vsub.s32 7, %v16_v3 }
   0x8   :  { %v47_v22 = vcombine.low %v18_v14, %v22_v15  ;;  %v48_v23 = vcombine.low %v26_v16, %v30_v17 }
   0x9   :  { %v46_v24 = vrot.slane %v13_v4, %v45_v21  ;;  %v64_v25 = vcombine.low %v34_v18, %v38_v19 }
   0xa   :  { %v55_v26 = vrot.slane %v47_v22, %v54_v10  ;;  %v62_v27 = vrot.slane %v48_v23, %v54_v10 }
   0xb   :  { %v65_v29 = vcombine.low %v42_v20, %v46_v24  ;;  %v72_v30 = vrot.slane %v64_v25, %v54_v10 }
   0xc   :  { %v63_v31 = vcombine.low %v55_v26, %v62_v27 }
   0xd   :  { %v79_v32 = vrot.slane %v65_v29, %v54_v10 }
   0xe   :  { %v83_v33 = vadd.f32 %v63_v31, %v11_v28 }
   0xf   :  { %v80_v35 = vcombine.low %v72_v30, %v79_v32 }
  0x10   :  { %85 = vst [vmem:[%s125_s2] sm:$0xff] %v83_v33 }
  0x11   :  { %v84_v36 = vadd.f32 %v80_v35, %v12_v34 }
  0x13   :  { %86 = vst [vmem:[%s125_s2 + $0x8] sm:$0xff] %v84_v36 }

</bundles_post_ra>
